<compile_context>
chip_gen: v7x
topology: tpu7x:2x2x1
jax: 0.10.0
libtpu: 0.0.40
codegen_flags: <defaults>
</compile_context>

<pallas_src>
import functools

import jax
import jax.numpy as jnp
from jax import lax
from jax.experimental import pallas as pl
from jax.experimental.pallas import tpu as pltpu

LN_EPS = 1e-5


def _round_up(x, m):
    return (x + m - 1) // m * m


# ---------------------------------------------------------------------------
# Kernel: one row-tile of  Linear -> ReLU -> LayerNorm  (dropout = identity).
# ---------------------------------------------------------------------------
def _embed_kernel(x_ref, w_ref, b_ref, g_ref, beta_ref, o_ref, *, compute_dtype):
    """
    x_ref    : (tm, D_in)     input dtype (cast to compute_dtype for the MXU)
    w_ref    : (D_in, D_out)  compute_dtype (prepared once, typically bf16)
    b_ref    : (1, D_out)     f32 linear bias
    g_ref    : (1, D_out)     f32 LayerNorm gamma
    beta_ref : (1, D_out)     f32 LayerNorm beta
    o_ref    : (tm, D_out)    input dtype
    """
    x = x_ref[...].astype(compute_dtype)              # bf16 MXU operands
    h = jnp.dot(x, w_ref[...], preferred_element_type=jnp.float32)
    h = jnp.maximum(h + b_ref[...], 0.0)               # bias + ReLU, f32

    # Two-pass LayerNorm over the feature axis (numerically stable).
    inv_d = jnp.float32(1.0 / h.shape[-1])
    mean = jnp.sum(h, axis=-1, keepdims=True) * inv_d
    c = h - mean
    var = jnp.sum(c * c, axis=-1, keepdims=True) * inv_d
    scale = g_ref[...] * lax.rsqrt(var + LN_EPS)        # gamma folded into rstd
    o_ref[...] = (c * scale + beta_ref[...]).astype(o_ref.dtype)


# ---------------------------------------------------------------------------
# Generation-aware tile / VMEM-limit selection.
# ---------------------------------------------------------------------------
def _tile_and_vmem(m, d_in, d_out, x_itemsize, w_itemsize, out_itemsize):
    try:
        vmem_cap = pltpu.get_tpu_info().vmem_capacity_bytes
    except Exception:
        vmem_cap = 64 * 1024 * 1024          # conservative: v7x per-core VMEM
    # Scoped limit: above the 16/32 MiB defaults, below physical VMEM.
    vmem_limit = int(min((vmem_cap * 3) // 4, 64 * 1024 * 1024))
    budget = (vmem_limit * 7) // 8

    params_bytes = d_in * d_out * w_itemsize + 3 * d_out * 4
    tm = 128
    for cand in (512, 256, 128):
        need = (2 * cand * d_in * x_itemsize        # double-buffered x tiles
                + 2 * cand * d_out * out_itemsize   # double-buffered out tiles
                + 2 * params_bytes                  # params (worst case 2 bufs)
                + 4 * cand * d_out * 4)             # f32 intermediates (h, c, y, tmp)
        if need <= budget:
            tm = cand
            break
    # Don't allocate an oversized tile for tiny inputs (still a multiple of 8).
    tm = min(tm, _round_up(max(m, 1), 8))
    return int(tm), vmem_limit


# Whether this jax build supports single-buffered BlockSpecs; downgraded
# automatically on the first lowering failure.
_SINGLE_BUFFER_OK = hasattr(pl, "Buffered")


def _embed_path(x2d, w, b, g, beta, *, compute_dtype):
    """Linear -> ReLU -> LayerNorm over rows of x2d: (M, D_in) -> (M, D_out)."""
    global _SINGLE_BUFFER_OK
    m, d_in = x2d.shape
    d_out = w.shape[1]
    tm, vmem_limit = _tile_and_vmem(
        m, d_in, d_out,
        jnp.dtype(x2d.dtype).itemsize,
        jnp.dtype(w.dtype).itemsize,
        jnp.dtype(x2d.dtype).itemsize,
    )
    n_tiles = pl.cdiv(m, tm)
    kernel = functools.partial(_embed_kernel, compute_dtype=compute_dtype)

    def build(single_buffer):
        # Weight / bias / gamma / beta block indices never change across the
        # grid -> single-buffer them when supported (saves a full weight slab
        # of VMEM, which matters most on v7x's 64 MiB).
        pm = {"pipeline_mode": pl.Buffered(1)} if single_buffer else {}
        in_specs = [
            pl.BlockSpec((tm, d_in), lambda i: (i, 0)),
            pl.BlockSpec((d_in, d_out), lambda i: (0, 0), **pm),
            pl.BlockSpec((1, d_out), lambda i: (0, 0), **pm),
            pl.BlockSpec((1, d_out), lambda i: (0, 0), **pm),
            pl.BlockSpec((1, d_out), lambda i: (0, 0), **pm),
        ]
        return pl.pallas_call(
            kernel,
            out_shape=jax.ShapeDtypeStruct((m, d_out), x2d.dtype),
            grid_spec=pltpu.PrefetchScalarGridSpec(
                num_scalar_prefetch=0,
                grid=(n_tiles,),
                in_specs=in_specs,
                out_specs=pl.BlockSpec((tm, d_out), lambda i: (i, 0)),
            ),
            compiler_params=pltpu.CompilerParams(
                # Row tiles are independent -> shard across TensorCores (v7x).
                dimension_semantics=("parallel",),
                vmem_limit_bytes=vmem_limit,
            ),
        )

    if _SINGLE_BUFFER_OK:
        try:
            return build(True)(x2d, w, b, g, beta)
        except Exception:
            _SINGLE_BUFFER_OK = False   # this build rejects Buffered(1); fall back
    return build(False)(x2d, w, b, g, beta)


# ---------------------------------------------------------------------------
# Parameter prep (one-time) and forward pass.
# ---------------------------------------------------------------------------
def prepare_params(params, compute_dtype=jnp.bfloat16):
    """One-time parameter preparation, hoisted out of the per-step path:
    matmul weights cast to the MXU compute dtype (bf16 by default); bias and
    LayerNorm affine parameters kept in f32 and reshaped to (1, D) rows."""
    def vec(v):
        return jnp.asarray(v, jnp.float32).reshape(1, -1)
    return {
        "grid_w": jnp.asarray(params["grid_w"], compute_dtype),
        "grid_b": vec(params["grid_b"]),
        "grid_ln_g": vec(params["grid_ln_g"]),
        "grid_ln_b": vec(params["grid_ln_b"]),
        "region_w": jnp.asarray(params["region_w"], compute_dtype),
        "region_b": vec(params["region_b"]),
        "region_ln_g": vec(params["region_ln_g"]),
        "region_ln_b": vec(params["region_ln_b"]),
    }


def dual_visual_embedding(grid_feats, region_feats, prepared, *, dropout=0.0,
                          training=False):
    """Forward pass of DualVisualEmbedding (eval mode).

    grid_feats  : (B, T, N_g, grid_in_dim)
    region_feats: (B, N_r, region_in_dim)
    prepared    : output of prepare_params()
    returns {'ATT_FEATS': region_embeddings, 'ATT_FEATS_WO_MASK': grid_embeddings}
    """
    if training and dropout > 0.0:
        # TODO(synk): training-mode dropout (pltpu.prng_* masking) not implemented.
        raise NotImplementedError("training-mode dropout is not implemented")

    B, T, Ng, Dg = grid_feats.shape
    Br, Nr, Dr = region_feats.shape
    out_dim = prepared["grid_w"].shape[1]
    compute_dtype = prepared["grid_w"].dtype

    # 'B T N D -> (B T) N D' then row-flatten; both reshapes are free (no copy).
    gy = _embed_path(grid_feats.reshape(B * T * Ng, Dg),
                     prepared["grid_w"], prepared["grid_b"],
                     prepared["grid_ln_g"], prepared["grid_ln_b"],
                     compute_dtype=compute_dtype)
    ry = _embed_path(region_feats.reshape(Br * Nr, Dr),
                     prepared["region_w"], prepared["region_b"],
                     prepared["region_ln_g"], prepared["region_ln_b"],
                     compute_dtype=compute_dtype)

    return {
        "ATT_FEATS": ry.reshape(Br, Nr, out_dim),
        "ATT_FEATS_WO_MASK": gy.reshape(B * T, Ng, out_dim),
    }


# ---------------------------------------------------------------------------
# Demo / self-check helpers.
# ---------------------------------------------------------------------------
def init_params(key, grid_in_dim, region_in_dim, out_dim):
    ks = jax.random.split(key, 4)
    return {
        "grid_w": jax.random.normal(ks[0], (grid_in_dim, out_dim), jnp.float32)
                  / jnp.sqrt(jnp.float32(grid_in_dim)),
        "grid_b": 0.01 * jax.random.normal(ks[1], (out_dim,), jnp.float32),
        "grid_ln_g": jnp.ones((out_dim,), jnp.float32),
        "grid_ln_b": jnp.zeros((out_dim,), jnp.float32),
        "region_w": jax.random.normal(ks[2], (region_in_dim, out_dim), jnp.float32)
                    / jnp.sqrt(jnp.float32(region_in_dim)),
        "region_b": 0.01 * jax.random.normal(ks[3], (out_dim,), jnp.float32),
        "region_ln_g": jnp.ones((out_dim,), jnp.float32),
        "region_ln_b": jnp.zeros((out_dim,), jnp.float32),
    }


def _reference(grid_feats, region_feats, params, compute_dtype):
    """Pure-JAX reference; quantizes the matmul operands exactly like the
    kernel (compute_dtype operands, f32 accumulation and f32 LayerNorm)."""
    def path(x2d, w, b, g, bt):
        xq = x2d.astype(compute_dtype).astype(jnp.float32)
        wq = w.astype(compute_dtype).astype(jnp.float32)
        h = jnp.maximum(xq @ wq + b, 0.0)
        mu = h.mean(-1, keepdims=True)
        var = ((h - mu) ** 2).mean(-1, keepdims=True)
        return (h - mu) / jnp.sqrt(var + LN_EPS) * g + bt

    B, T, Ng, Dg = grid_feats.shape
    Br, Nr, Dr = region_feats.shape
    out_dim = params["grid_w"].shape[1]
    gy = path(grid_feats.reshape(-1, Dg), params["grid_w"], params["grid_b"],
              params["grid_ln_g"], params["grid_ln_b"]).reshape(B * T, Ng, out_dim)
    ry = path(region_feats.reshape(-1, Dr), params["region_w"], params["region_b"],
              params["region_ln_g"], params["region_ln_b"]).reshape(Br, Nr, out_dim)
    return {"ATT_FEATS": ry, "ATT_FEATS_WO_MASK": gy}


if __name__ == "__main__":
    key = jax.random.PRNGKey(0)
    k_g, k_r, k_p = jax.random.split(key, 3)

    # Small, shape-consistent example. Feature dims are kept 128-aligned (the
    # typical production case), so the kernel runs fully lane-dense with zero
    # padding or slicing anywhere.
    B, T, Ng, Nr = 2, 2, 8, 8
    GRID_IN, REGION_IN, OUT = 128, 256, 128

    grid_feats = jax.random.normal(k_g, (B, T, Ng, GRID_IN), jnp.float32)
    region_feats = jax.random.normal(k_r, (B, Nr, REGION_IN), jnp.float32)
    params = init_params(k_p, GRID_IN, REGION_IN, OUT)
    prepared = prepare_params(params, compute_dtype=jnp.bfloat16)

    out = dual_visual_embedding(grid_feats, region_feats, prepared)
    jax.block_until_ready(out)

    ref = _reference(grid_feats, region_feats, params, jnp.bfloat16)
    assert out["ATT_FEATS"].shape == (B, Nr, OUT)
    assert out["ATT_FEATS_WO_MASK"].shape == (B * T, Ng, OUT)
    for name in ("ATT_FEATS", "ATT_FEATS_WO_MASK"):
        err = float(jnp.max(jnp.abs(out[name].astype(jnp.float32) - ref[name])))
        assert err < 5e-3, f"{name} mismatch: {err}"

    print("KERNEL_OK")
</pallas_src>

<mosaic_0001>
module attributes {stable_mosaic.version = 11 : i64} {
  func.func @_embed_kernel(%arg0: i32, %arg1: memref<32x128xf32, #tpu.memory_space<vmem>>, %arg2: memref<128x128xbf16, #tpu.memory_space<vmem>>, %arg3: memref<1x128xf32, #tpu.memory_space<vmem>>, %arg4: memref<1x128xf32, #tpu.memory_space<vmem>>, %arg5: memref<1x128xf32, #tpu.memory_space<vmem>>, %arg6: memref<32x128xf32, #tpu.memory_space<vmem>>) attributes {dimension_semantics = [#tpu.dimension_semantics<parallel>], iteration_bounds = array<i64: 1>, scalar_prefetch = 0 : i64, scratch_operands = 0 : i64, tpu.core_type = #tpu.core_type<tc>, window_params = [{transform_indices = @transform_0, window_bounds = array<i64: 32, 128>}, {pipeline_mode = #tpu.pipeline_mode<synchronous>, transform_indices = @transform_1, window_bounds = array<i64: 128, 128>}, {pipeline_mode = #tpu.pipeline_mode<synchronous>, transform_indices = @transform_2, window_bounds = array<i64: 1, 128>}, {pipeline_mode = #tpu.pipeline_mode<synchronous>, transform_indices = @transform_3, window_bounds = array<i64: 1, 128>}, {pipeline_mode = #tpu.pipeline_mode<synchronous>, transform_indices = @transform_4, window_bounds = array<i64: 1, 128>}, {transform_indices = @transform_5, window_bounds = array<i64: 32, 128>}]} {
    %c0 = arith.constant 0 : index
    %c0_0 = arith.constant 0 : index
    %0 = vector.load %arg1[%c0, %c0_0] : memref<32x128xf32, #tpu.memory_space<vmem>>, vector<32x128xf32>
    %1 = arith.truncf %0 : vector<32x128xf32> to vector<32x128xbf16>
    %c0_1 = arith.constant 0 : index
    %c0_2 = arith.constant 0 : index
    %2 = vector.load %arg2[%c0_1, %c0_2] : memref<128x128xbf16, #tpu.memory_space<vmem>>, vector<128x128xbf16>
    %cst = arith.constant dense<0.000000e+00> : vector<32x128xf32>
    %3 = tpu.matmul %1, %2, %cst {dimension_numbers = #tpu.dot_dimension_numbers<[1], [0], [0], [1], [0, 0, 1, 1], [], []>} : vector<32x128xbf16>, vector<128x128xbf16>, vector<32x128xf32> -> vector<32x128xf32>
    %c0_3 = arith.constant 0 : index
    %c0_4 = arith.constant 0 : index
    %4 = vector.load %arg3[%c0_3, %c0_4] : memref<1x128xf32, #tpu.memory_space<vmem>>, vector<1x128xf32>
    %5 = vector.broadcast %4 : vector<1x128xf32> to vector<32x128xf32>
    %6 = arith.addf %3, %5 : vector<32x128xf32>
    %cst_5 = arith.constant 0.000000e+00 : f32
    %7 = vector.broadcast %cst_5 : f32 to vector<32x128xf32>
    %8 = arith.maximumf %6, %7 : vector<32x128xf32>
    %cst_6 = arith.constant dense<0.000000e+00> : vector<32xf32>
    %9 = vector.multi_reduction <add>, %8, %cst_6 [1] : vector<32x128xf32> to vector<32xf32>
    %10 = vector.shape_cast %9 : vector<32xf32> to vector<32x1xf32>
    %cst_7 = arith.constant 7.812500e-03 : f32
    %11 = vector.broadcast %cst_7 : f32 to vector<32x1xf32>
    %12 = arith.mulf %10, %11 : vector<32x1xf32>
    %13 = vector.broadcast %12 : vector<32x1xf32> to vector<32x128xf32>
    %14 = arith.subf %8, %13 : vector<32x128xf32>
    %15 = arith.mulf %14, %14 : vector<32x128xf32>
    %cst_8 = arith.constant dense<0.000000e+00> : vector<32xf32>
    %16 = vector.multi_reduction <add>, %15, %cst_8 [1] : vector<32x128xf32> to vector<32xf32>
    %17 = vector.shape_cast %16 : vector<32xf32> to vector<32x1xf32>
    %cst_9 = arith.constant 7.812500e-03 : f32
    %18 = vector.broadcast %cst_9 : f32 to vector<32x1xf32>
    %19 = arith.mulf %17, %18 : vector<32x1xf32>
    %c0_10 = arith.constant 0 : index
    %c0_11 = arith.constant 0 : index
    %20 = vector.load %arg4[%c0_10, %c0_11] : memref<1x128xf32, #tpu.memory_space<vmem>>, vector<1x128xf32>
    %cst_12 = arith.constant 9.99999974E-6 : f32
    %21 = vector.broadcast %cst_12 : f32 to vector<32x1xf32>
    %22 = arith.addf %19, %21 : vector<32x1xf32>
    %23 = math.rsqrt %22 : vector<32x1xf32>
    %24 = vector.broadcast %20 : vector<1x128xf32> to vector<32x128xf32>
    %25 = vector.broadcast %23 : vector<32x1xf32> to vector<32x128xf32>
    %26 = arith.mulf %24, %25 : vector<32x128xf32>
    %27 = arith.mulf %14, %26 : vector<32x128xf32>
    %c0_13 = arith.constant 0 : index
    %c0_14 = arith.constant 0 : index
    %28 = vector.load %arg5[%c0_13, %c0_14] : memref<1x128xf32, #tpu.memory_space<vmem>>, vector<1x128xf32>
    %29 = vector.broadcast %28 : vector<1x128xf32> to vector<32x128xf32>
    %30 = arith.addf %27, %29 : vector<32x128xf32>
    %c0_15 = arith.constant 0 : index
    %c0_16 = arith.constant 0 : index
    %31 = vector.load %arg6[%c0_15, %c0_16] : memref<32x128xf32, #tpu.memory_space<vmem>>, vector<32x128xf32>
    tpu.vector_store %arg6[%c0_15, %c0_16], %30 {strides = array<i32>} : memref<32x128xf32, #tpu.memory_space<vmem>>, vector<32x128xf32>,
    return
  }
  func.func @transform_0(%arg0: i32) -> (i32, i32) {
    %c0_i32 = arith.constant 0 : i32
    %c0_i32_0 = arith.constant 0 : i32
    return %arg0, %c0_i32 : i32, i32
  }
  func.func @transform_1(%arg0: i32) -> (i32, i32) {
    %c0_i32 = arith.constant 0 : i32
    %c0_i32_0 = arith.constant 0 : i32
    %c0_i32_1 = arith.constant 0 : i32
    return %c0_i32, %c0_i32_0 : i32, i32
  }
  func.func @transform_2(%arg0: i32) -> (i32, i32) {
    %c0_i32 = arith.constant 0 : i32
    %c0_i32_0 = arith.constant 0 : i32
    %c0_i32_1 = arith.constant 0 : i32
    return %c0_i32, %c0_i32_0 : i32, i32
  }
  func.func @transform_3(%arg0: i32) -> (i32, i32) {
    %c0_i32 = arith.constant 0 : i32
    %c0_i32_0 = arith.constant 0 : i32
    %c0_i32_1 = arith.constant 0 : i32
    return %c0_i32, %c0_i32_0 : i32, i32
  }
  func.func @transform_4(%arg0: i32) -> (i32, i32) {
    %c0_i32 = arith.constant 0 : i32
    %c0_i32_0 = arith.constant 0 : i32
    %c0_i32_1 = arith.constant 0 : i32
    return %c0_i32, %c0_i32_0 : i32, i32
  }
  func.func @transform_5(%arg0: i32) -> (i32, i32) {
    %c0_i32 = arith.constant 0 : i32
    %c0_i32_0 = arith.constant 0 : i32
    return %arg0, %c0_i32 : i32, i32
  }
}

module attributes {stable_mosaic.version = 11 : i64} {
  func.func @_embed_kernel(%arg0: i32, %arg1: memref<32x128xf32, #tpu.memory_space<vmem>>, %arg2: memref<128x128xbf16, #tpu.memory_space<vmem>>, %arg3: memref<1x128xf32, #tpu.memory_space<vmem>>, %arg4: memref<1x128xf32, #tpu.memory_space<vmem>>, %arg5: memref<1x128xf32, #tpu.memory_space<vmem>>, %arg6: memref<32x128xf32, #tpu.memory_space<vmem>>) attributes {dimension_semantics = [#tpu.dimension_semantics<parallel>], iteration_bounds = array<i64: 1>, scalar_prefetch = 0 : i64, scratch_operands = 0 : i64, tpu.core_type = #tpu.core_type<tc>, window_params = [{transform_indices = @transform_0, window_bounds = array<i64: 32, 128>}, {pipeline_mode = #tpu.pipeline_mode<synchronous>, transform_indices = @transform_1, window_bounds = array<i64: 128, 128>}, {pipeline_mode = #tpu.pipeline_mode<synchronous>, transform_indices = @transform_2, window_bounds = array<i64: 1, 128>}, {pipeline_mode = #tpu.pipeline_mode<synchronous>, transform_indices = @transform_3, window_bounds = array<i64: 1, 128>}, {pipeline_mode = #tpu.pipeline_mode<synchronous>, transform_indices = @transform_4, window_bounds = array<i64: 1, 128>}, {transform_indices = @transform_5, window_bounds = array<i64: 32, 128>}]} {
    %c0 = arith.constant 0 : index
    %c0_0 = arith.constant 0 : index
    %0 = vector.load %arg1[%c0, %c0_0] : memref<32x128xf32, #tpu.memory_space<vmem>>, vector<32x128xf32>
    %1 = arith.truncf %0 : vector<32x128xf32> to vector<32x128xbf16>
    %c0_1 = arith.constant 0 : index
    %c0_2 = arith.constant 0 : index
    %2 = vector.load %arg2[%c0_1, %c0_2] : memref<128x128xbf16, #tpu.memory_space<vmem>>, vector<128x128xbf16>
    %cst = arith.constant dense<0.000000e+00> : vector<32x128xf32>
    %3 = tpu.matmul %1, %2, %cst {dimension_numbers = #tpu.dot_dimension_numbers<[1], [0], [0], [1], [0, 0, 1, 1], [], []>} : vector<32x128xbf16>, vector<128x128xbf16>, vector<32x128xf32> -> vector<32x128xf32>
    %c0_3 = arith.constant 0 : index
    %c0_4 = arith.constant 0 : index
    %4 = vector.load %arg3[%c0_3, %c0_4] : memref<1x128xf32, #tpu.memory_space<vmem>>, vector<1x128xf32>
    %5 = vector.broadcast %4 : vector<1x128xf32> to vector<32x128xf32>
    %6 = arith.addf %3, %5 : vector<32x128xf32>
    %cst_5 = arith.constant 0.000000e+00 : f32
    %7 = vector.broadcast %cst_5 : f32 to vector<32x128xf32>
    %8 = arith.maximumf %6, %7 : vector<32x128xf32>
    %cst_6 = arith.constant dense<0.000000e+00> : vector<32xf32>
    %9 = vector.multi_reduction <add>, %8, %cst_6 [1] : vector<32x128xf32> to vector<32xf32>
    %10 = vector.shape_cast %9 : vector<32xf32> to vector<32x1xf32>
    %cst_7 = arith.constant 7.812500e-03 : f32
    %11 = vector.broadcast %cst_7 : f32 to vector<32x1xf32>
    %12 = arith.mulf %10, %11 : vector<32x1xf32>
    %13 = vector.broadcast %12 : vector<32x1xf32> to vector<32x128xf32>
    %14 = arith.subf %8, %13 : vector<32x128xf32>
    %15 = arith.mulf %14, %14 : vector<32x128xf32>
    %cst_8 = arith.constant dense<0.000000e+00> : vector<32xf32>
    %16 = vector.multi_reduction <add>, %15, %cst_8 [1] : vector<32x128xf32> to vector<32xf32>
    %17 = vector.shape_cast %16 : vector<32xf32> to vector<32x1xf32>
    %cst_9 = arith.constant 7.812500e-03 : f32
    %18 = vector.broadcast %cst_9 : f32 to vector<32x1xf32>
    %19 = arith.mulf %17, %18 : vector<32x1xf32>
    %c0_10 = arith.constant 0 : index
    %c0_11 = arith.constant 0 : index
    %20 = vector.load %arg4[%c0_10, %c0_11] : memref<1x128xf32, #tpu.memory_space<vmem>>, vector<1x128xf32>
    %cst_12 = arith.constant 9.99999974E-6 : f32
    %21 = vector.broadcast %cst_12 : f32 to vector<32x1xf32>
    %22 = arith.addf %19, %21 : vector<32x1xf32>
    %23 = math.rsqrt %22 : vector<32x1xf32>
    %24 = vector.broadcast %20 : vector<1x128xf32> to vector<32x128xf32>
    %25 = vector.broadcast %23 : vector<32x1xf32> to vector<32x128xf32>
    %26 = arith.mulf %24, %25 : vector<32x128xf32>
    %27 = arith.mulf %14, %26 : vector<32x128xf32>
    %c0_13 = arith.constant 0 : index
    %c0_14 = arith.constant 0 : index
    %28 = vector.load %arg5[%c0_13, %c0_14] : memref<1x128xf32, #tpu.memory_space<vmem>>, vector<1x128xf32>
    %29 = vector.broadcast %28 : vector<1x128xf32> to vector<32x128xf32>
    %30 = arith.addf %27, %29 : vector<32x128xf32>
    %c0_15 = arith.constant 0 : index
    %c0_16 = arith.constant 0 : index
    %31 = vector.load %arg6[%c0_15, %c0_16] : memref<32x128xf32, #tpu.memory_space<vmem>>, vector<32x128xf32>
    tpu.vector_store %arg6[%c0_15, %c0_16], %30 {strides = array<i32>} : memref<32x128xf32, #tpu.memory_space<vmem>>, vector<32x128xf32>,
    return
  }
  func.func @transform_0(%arg0: i32) -> (i32, i32) {
    %c0_i32 = arith.constant 0 : i32
    %c0_i32_0 = arith.constant 0 : i32
    return %arg0, %c0_i32 : i32, i32
  }
  func.func @transform_1(%arg0: i32) -> (i32, i32) {
    %c0_i32 = arith.constant 0 : i32
    %c0_i32_0 = arith.constant 0 : i32
    %c0_i32_1 = arith.constant 0 : i32
    return %c0_i32, %c0_i32_0 : i32, i32
  }
  func.func @transform_2(%arg0: i32) -> (i32, i32) {
    %c0_i32 = arith.constant 0 : i32
    %c0_i32_0 = arith.constant 0 : i32
    %c0_i32_1 = arith.constant 0 : i32
    return %c0_i32, %c0_i32_0 : i32, i32
  }
  func.func @transform_3(%arg0: i32) -> (i32, i32) {
    %c0_i32 = arith.constant 0 : i32
    %c0_i32_0 = arith.constant 0 : i32
    %c0_i32_1 = arith.constant 0 : i32
    return %c0_i32, %c0_i32_0 : i32, i32
  }
  func.func @transform_4(%arg0: i32) -> (i32, i32) {
    %c0_i32 = arith.constant 0 : i32
    %c0_i32_0 = arith.constant 0 : i32
    %c0_i32_1 = arith.constant 0 : i32
    return %c0_i32, %c0_i32_0 : i32, i32
  }
  func.func @transform_5(%arg0: i32) -> (i32, i32) {
    %c0_i32 = arith.constant 0 : i32
    %c0_i32_0 = arith.constant 0 : i32
    return %arg0, %c0_i32 : i32, i32
  }
}

</mosaic_0001>

<bundles_post_ra>
// kernel: tpu_custom_call.1
= control target key start
LH: loop header
LB: loop body
LE: loop exit
PB: predicated region body
PF: predicated region fallthrough
CT: control target
= control target key end

     0   :  { %10 = vsyncpa [#allocation3], 0  ;;  %s492_s0 = inlined_call_operand.hbm [shape: f32[32,128], index: 0, kind: input, shape index: {}]   ;;  %s493_s1 = inlined_call_operand.hbm [shape: bf16[128,128], index: 1, kind: input, shape index: {}]   ;;  %s494_s2 = inlined_call_operand.vmem [shape: f32[1,128], index: 2, kind: input, shape index: {}]   ;;  %s495_s3 = inlined_call_operand.vmem [shape: f32[1,128], index: 3, kind: input, shape index: {}]   ;;  %s496_s4 = inlined_call_operand.vmem [shape: f32[1,128], index: 4, kind: input, shape index: {}]   ;;  %s497_s5 = inlined_call_operand.hbm [shape: f32[32,128], index: 5, kind: output, shape index: {}]  }
   0x1   :  { %11 = vsyncpa [#allocation6], 0 }
   0x2   :  { %12 = vsyncpa [#allocation4], 0  ;;  %s404_s18 = smov [#allocation2]   ;;  %s332_s22 = scalar_lea.hbm %s492_s0, 512 }
   0x3   :  { %s18_s19 = sshll.u32 %s404_s18, 4  ;;  %p333_p0 = scmp.ne.s32.totalorder %s492_s0, %s332_s22  ;;  %s19_s19 = int_to_ptr.vmem [resolvable:$true] %s18_s19 }
   0x4   :  { %p336_p1 = scmp.lt.u32.totalorder %s332_s22, %s492_s0 }
   0x6   :  { %p338_p2 = pnand %p336_p1, %p333_p0 }
   0x8   :  { %341 = shalt.err (!%p338_p2)
}
   0x9   :  { %s342_s27 = scalar_lea.vmem %s19_s19, 512  ;;  %p347_p4 = scmp.lt.s32.totalorder %s19_s19, %s19_s19 }
   0xa   :  { %p343_p3 = scmp.ne.s32.totalorder %s19_s19, %s342_s27  ;;  %p348_p5 = scmp.lt.s32.totalorder %s342_s27, %s342_s27 }
   0xc   :  { %p349_p6 = por %p348_p5, %p347_p4 }
   0xe   :  { %p350_p7 = pnand %p349_p6, %p343_p3 }
  0x10   :  { %353 = shalt.err (!%p350_p7)
}
  0x11   :  { %s405_s28 = smov 128   ;;  %s406_s29 = smov 8  }
  0x12   :  { %24 = dma.hbm_to_vmem [thread:$0]  %s492_s0, 512, %s19_s19, [#allocation3], %s405_s28, %s405_s28, %s406_s29  }
  0x13   :  { %s407_s7 = smov [#allocation5]   ;;  %s354_s11 = scalar_lea.hbm %s493_s1, 1024 }
  0x14   :  { %s30_s8 = sshll.u32 %s407_s7, 4  ;;  %p355_p8 = scmp.ne.s32.totalorder %s493_s1, %s354_s11  ;;  %s31_s8 = int_to_ptr.vmem [resolvable:$true] %s30_s8 }
  0x15   :  { %p358_p9 = scmp.lt.u32.totalorder %s354_s11, %s493_s1 }
  0x17   :  { %p360_p10 = pnand %p358_p9, %p355_p8 }
  0x19   :  { %363 = shalt.err (!%p360_p10)
}
  0x1a   :  { %s364_s16 = scalar_lea.vmem %s31_s8, 1024  ;;  %p369_p12 = scmp.lt.s32.totalorder %s31_s8, %s31_s8 }
  0x1b   :  { %p365_p11 = scmp.ne.s32.totalorder %s31_s8, %s364_s16  ;;  %p370_p13 = scmp.lt.s32.totalorder %s364_s16, %s364_s16 }
  0x1d   :  { %p371_p0 = por %p370_p13, %p369_p12 }
  0x1f   :  { %p372_p1 = pnand %p371_p0, %p365_p11 }
  0x21   :  { %375 = shalt.err (!%p372_p1)
}
  0x22   :  { %s408_s0 = smov 64   ;;  %s409_s17 = smov 4  }
  0x23   :  { %36 = dma.hbm_to_vmem [thread:$0]  %s493_s1, 1024, %s31_s8, [#allocation6], %s408_s0, %s408_s0, %s409_s17  }
  0x24   :  { %398 = dma.done.wait [#allocation3], 512  }
  0x25   :  { %399 = vsyncadd [#allocation3], 4294966784 }
  0x26   :  { %400 = dma.done.wait [#allocation6], 1024  }
  0x27   :  { %401 = vsyncadd [#allocation6], 4294966272  ;;  %v316_v0 = vld [vmem:[#allocation5] sm:$0xff]   ;;  %v317_v1 = vld [vmem:[#allocation5 + $0x8] sm:$0xff]  }
  0x28   :  { %289 = vmatprep.subr.bf16.mxu0 %v316_v0  ;;  %v318_v2 = vld [vmem:[#allocation5 + $0x10] sm:$0xff]   ;;  %v319_v3 = vld [vmem:[#allocation5 + $0x18] sm:$0xff]   ;;  %v50_v4 = vld [vmem:[#allocation2] sm:$0xff] }
  0x29   :  { %290 = vmatpush3.bf16.msra.mxu0 %v316_v0  ;;  %v51_v5 = vld [vmem:[#allocation2 + $0x8] sm:$0xff]  ;;  %v320_v7 = vld [vmem:[#allocation5 + $0x20] sm:$0xff]   ;;  %v322_v9 = vld [vmem:[#allocation5 + $0x30] sm:$0xff]  }
  0x2a   :  { %291 = vmatprep.subr.bf16.mxu0 %v317_v1  ;;  %v54_v6 = vpack.c.bf16 %v51_v5, %v50_v4  ;;  %v321_v8 = vld [vmem:[#allocation5 + $0x28] sm:$0xff]   ;;  %v323_v10 = vld [vmem:[#allocation5 + $0x38] sm:$0xff]   ;;  %v52_v11 = vld [vmem:[#allocation2 + $0x10] sm:$0xff] }
  0x2b   :  { %v53_v12 = vld [vmem:[#allocation2 + $0x18] sm:$0xff]  ;;  %v268_v14 = vld [vmem:[%s494_s2] ss:$0 sm:$0xff] }
  0x2c   :  { %305 = vmatprep.mubr.bf16.mxu0 %v54_v6  ;;  %v55_v13 = vpack.c.bf16 %v53_v12, %v52_v11  ;;  %v277_v55 = vld [vmem:[%s495_s3] ss:$0 sm:$0xff]  ;;  %s410_s3 = smov [#allocation7]  }
  0x2d   :  { %292 = vmatpush3.bf16.msra.mxu0 %v317_v1  ;;  %v278_v58 = vld [vmem:[%s496_s4] ss:$0 sm:$0xff]  ;;  %s255_s24 = sshll.u32 %s410_s3, 4  ;;  %s256_s24 = int_to_ptr.vmem [resolvable:$true] %s255_s24 }
  0x2e   :  { %293 = vmatprep.subr.bf16.mxu0 %v318_v2  ;;  %s376_s4 = scalar_lea.vmem %s256_s24, 512  ;;  %p381_p3 = scmp.lt.s32.totalorder %s256_s24, %s256_s24 }
  0x2f   :  { %p377_p2 = scmp.ne.s32.totalorder %s256_s24, %s376_s4  ;;  %p382_p4 = scmp.lt.s32.totalorder %s376_s4, %s376_s4 }
  0x31   :  { %294 = vmatpush3.bf16.msra.mxu0 %v318_v2  ;;  %p383_p5 = por %p382_p4, %p381_p3 }
  0x32   :  { %295 = vmatprep.subr.bf16.mxu0 %v319_v3 }
  0x33   :  { %p384_p6 = pnand %p383_p5, %p377_p2 }
  0x35   :  { %296 = vmatpush3.bf16.msra.mxu0 %v319_v3 }
  0x36   :  { %297 = vmatprep.subr.bf16.mxu0 %v320_v7 }
  0x39   :  { %298 = vmatpush3.bf16.msra.mxu0 %v320_v7 }
  0x3a   :  { %299 = vmatprep.subr.bf16.mxu0 %v321_v8 }
  0x3d   :  { %300 = vmatpush3.bf16.msra.mxu0 %v321_v8 }
  0x3e   :  { %301 = vmatprep.subr.bf16.mxu0 %v322_v9 }
  0x41   :  { %302 = vmatpush3.bf16.msra.mxu0 %v322_v9 }
  0x42   :  { %303 = vmatprep.subr.bf16.mxu0 %v323_v10 }
  0x45   :  { %304 = vmatpush3.bf16.msra.mxu0 %v323_v10 }
  0x48   :  { %306 = vmatmul.mubr.bf16.vlgmr.msra.gmra.mrb[0].mxu0 %v55_v13 }
 0x11b   :  { %v307_v15 = vpop.f32.mrb[0].mxu0 }
 0x11c   :  { %v170_v16 = vadd.f32 %v307_v15, %v268_v14  ;;  %v161_v17 = vpop.f32.mrb[1].mxu0 }
 0x11d   :  { %v162_v18 = vadd.f32 %v268_v14, %v161_v17  ;;  %v308_v19 = vpop.f32.mrb[2].mxu0 }
 0x11e   :  { %v178_v20 = vmax.f32 %v170_v16, 0.0  ;;  %v173_v21 = vadd.f32 %v308_v19, %v268_v14  ;;  %v164_v22 = vpop.f32.mrb[3].mxu0 }
 0x11f   :  { %v176_v23 = vmax.f32 %v162_v18, 0.0  ;;  %v165_v24 = vadd.f32 %v268_v14, %v164_v22 }
 0x120   :  { %184 = vadd.xlane.f32.xlu1 %v178_v20  ;;  %v179_v25 = vmax.f32 %v173_v21, 0.0 }
 0x121   :  { %180 = vadd.xlane.f32.xlu0 %v176_v23  ;;  %v177_v26 = vmax.f32 %v165_v24, 0.0 }
 0x124   :  { %186 = vadd.xlane.f32.xlu1 %v179_v25 }
 0x125   :  { %182 = vadd.xlane.f32.xlu0 %v177_v26 }
 0x1ad   :  { %v185_v27 = vpop.xlane.xlu1 %184 }
 0x1ae   :  { %v181_v28 = vpop.xlane.xlu0 %180  ;;  %v190_v29 = vmul.f32 0.0078125, %v185_v27 }
 0x1af   :  { %v188_v30 = vmul.f32 0.0078125, %v181_v28 }
 0x1b0   :  { %v194_v34 = vsub.f32 %v178_v20, %v190_v29 }
 0x1b1   :  { %v192_v31 = vsub.f32 %v176_v23, %v188_v30  ;;  %v187_v32 = vpop.xlane.xlu1 %186 }
 0x1b2   :  { %v183_v33 = vpop.xlane.xlu0 %182  ;;  %v191_v35 = vmul.f32 0.0078125, %v187_v32  ;;  %v198_v40 = vmul.f32 %v194_v34, %v194_v34 }
 0x1b3   :  { %v189_v36 = vmul.f32 0.0078125, %v183_v33  ;;  %v196_v37 = vmul.f32 %v192_v31, %v192_v31 }
 0x1b4   :  { %v195_v39 = vsub.f32 %v179_v25, %v191_v35 }
 0x1b5   :  { %v193_v38 = vsub.f32 %v177_v26, %v189_v36  ;;  %200 = vadd.xlane.f32.xlu0 %v196_v37 }
 0x1b6   :  { %v199_v42 = vmul.f32 %v195_v39, %v195_v39 }
 0x1b7   :  { %v197_v41 = vmul.f32 %v193_v38, %v193_v38 }
 0x1b9   :  { %204 = vadd.xlane.f32.xlu0 %v198_v40  ;;  %202 = vadd.xlane.f32.xlu1 %v197_v41 }
 0x1bd   :  { %206 = vadd.xlane.f32.xlu1 %v199_v42 }
 0x242   :  { %v201_v43 = vpop.xlane.xlu0 %200 }
 0x243   :  { %v208_v44 = vmul.f32 0.0078125, %v201_v43 }
 0x245   :  { %v213_v45 = vadd.f32 1e-05, %v208_v44 }
 0x246   :  { %v203_v46 = vpop.xlane.xlu1 %202  ;;  %v205_v47 = vpop.xlane.xlu0 %204 }
 0x247   :  { %324 = vrsqrt.f32 %v213_v45  ;;  %v209_v48 = vmul.f32 0.0078125, %v203_v46  ;;  %v210_v49 = vmul.f32 0.0078125, %v205_v47 }
 0x249   :  { %v214_v50 = vadd.f32 1e-05, %v209_v48  ;;  %v215_v51 = vadd.f32 1e-05, %v210_v49 }
 0x24a   :  { %v207_v52 = vpop.xlane.xlu1 %206 }
 0x24b   :  { %326 = vrsqrt.f32 %v214_v50  ;;  %v211_v53 = vmul.f32 0.0078125, %v207_v52 }
 0x24c   :  { %328 = vrsqrt.f32 %v215_v51 }
 0x24d   :  { %v216_v54 = vadd.f32 1e-05, %v211_v53 }
 0x24f   :  { %330 = vrsqrt.f32 %v216_v54 }
 0x251   :  { %v325_v56 = vpop.eup %324 }
 0x252   :  { %v227_v57 = vmul.f32 %v325_v56, %v277_v55 }
 0x254   :  { %v231_v59 = vmul.f32 %v227_v57, %v192_v31 }
 0x255   :  { %v327_v60 = vpop.eup %326 }
 0x256   :  { %v329_v61 = vpop.eup %328  ;;  %v228_v62 = vmul.f32 %v327_v60, %v277_v55  ;;  %v242_v63 = vadd.f32 %v278_v58, %v231_v59 }
 0x257   :  { %v229_v0 = vmul.f32 %v329_v61, %v277_v55 }
 0x258   :  { %v232_v1 = vmul.f32 %v228_v62, %v193_v38  ;;  %246 = vst [vmem:[#allocation7] sm:$0xff] %v242_v63 }
 0x259   :  { %v331_v2 = vpop.eup %330  ;;  %v233_v3 = vmul.f32 %v229_v0, %v194_v34 }
 0x25a   :  { %v230_v4 = vmul.f32 %v331_v2, %v277_v55  ;;  %v243_v5 = vadd.f32 %v278_v58, %v232_v1 }
 0x25b   :  { %v244_v6 = vadd.f32 %v278_v58, %v233_v3 }
 0x25c   :  { %v234_v7 = vmul.f32 %v230_v4, %v195_v39  ;;  %247 = vst [vmem:[#allocation7 + $0x8] sm:$0xff] %v243_v5 }
 0x25d   :  { %248 = vst [vmem:[#allocation7 + $0x10] sm:$0xff] %v244_v6 }
 0x25e   :  { %v245_v8 = vadd.f32 %v278_v58, %v234_v7 }
 0x260   :  { %249 = vst [vmem:[#allocation7 + $0x18] sm:$0xff] %v245_v8 }
 0x261   :  { %387 = shalt.err (!%p384_p6)
}
 0x262   :  { %s388_s27 = scalar_lea.hbm %s497_s5, 512 }
 0x263   :  { %p389_p7 = scmp.ne.s32.totalorder %s497_s5, %s388_s27  ;;  %p392_p8 = scmp.lt.u32.totalorder %s388_s27, %s497_s5 }
 0x265   :  { %p394_p9 = pnand %p392_p8, %p389_p7 }
 0x267   :  { %397 = shalt.err (!%p394_p9)
}
 0x268   :  { %261 = dma.vmem_to_hbm [thread:$0]  %s256_s24, 512, %s497_s5, [#allocation4], %s405_s28, %s405_s28, %s406_s29  }
 0x269   :  { %402 = dma.done.wait [#allocation4], 512  }
 0x26a   :  { %403 = vsyncadd [#allocation4], 4294966784 }
 0x26b   :  { %265 = vsyncpa [#allocation3], 1 }
 0x26c   :  { %266 = vsyncpa [#allocation6], 1 }
 0x26d   :  { %267 = vsyncpa [#allocation4], 1 }

// kernel: tpu_custom_call.1
= control target key start
LH: loop header
LB: loop body
LE: loop exit
PB: predicated region body
PF: predicated region fallthrough
CT: control target
= control target key end

     0   :  { %10 = vsyncpa [#allocation3], 0  ;;  %s492_s0 = inlined_call_operand.hbm [shape: f32[32,128], index: 0, kind: input, shape index: {}]   ;;  %s493_s1 = inlined_call_operand.hbm [shape: bf16[128,128], index: 1, kind: input, shape index: {}]   ;;  %s494_s2 = inlined_call_operand.vmem [shape: f32[1,128], index: 2, kind: input, shape index: {}]   ;;  %s495_s3 = inlined_call_operand.vmem [shape: f32[1,128], index: 3, kind: input, shape index: {}]   ;;  %s496_s4 = inlined_call_operand.vmem [shape: f32[1,128], index: 4, kind: input, shape index: {}]   ;;  %s497_s5 = inlined_call_operand.hbm [shape: f32[32,128], index: 5, kind: output, shape index: {}]  }
   0x1   :  { %11 = vsyncpa [#allocation6], 0 }
   0x2   :  { %12 = vsyncpa [#allocation4], 0  ;;  %s404_s18 = smov [#allocation2]   ;;  %s332_s22 = scalar_lea.hbm %s492_s0, 512 }
   0x3   :  { %s18_s19 = sshll.u32 %s404_s18, 4  ;;  %p333_p0 = scmp.ne.s32.totalorder %s492_s0, %s332_s22  ;;  %s19_s19 = int_to_ptr.vmem [resolvable:$true] %s18_s19 }
   0x4   :  { %p336_p1 = scmp.lt.u32.totalorder %s332_s22, %s492_s0 }
   0x6   :  { %p338_p2 = pnand %p336_p1, %p333_p0 }
   0x8   :  { %341 = shalt.err (!%p338_p2)
}
   0x9   :  { %s342_s27 = scalar_lea.vmem %s19_s19, 512  ;;  %p347_p4 = scmp.lt.s32.totalorder %s19_s19, %s19_s19 }
   0xa   :  { %p343_p3 = scmp.ne.s32.totalorder %s19_s19, %s342_s27  ;;  %p348_p5 = scmp.lt.s32.totalorder %s342_s27, %s342_s27 }
   0xc   :  { %p349_p6 = por %p348_p5, %p347_p4 }
   0xe   :  { %p350_p7 = pnand %p349_p6, %p343_p3 }
  0x10   :  { %353 = shalt.err (!%p350_p7)
}
  0x11   :  { %s405_s28 = smov 128   ;;  %s406_s29 = smov 8  }
  0x12   :  { %24 = dma.hbm_to_vmem [thread:$0]  %s492_s0, 512, %s19_s19, [#allocation3], %s405_s28, %s405_s28, %s406_s29  }
  0x13   :  { %s407_s7 = smov [#allocation5]   ;;  %s354_s11 = scalar_lea.hbm %s493_s1, 1024 }
  0x14   :  { %s30_s8 = sshll.u32 %s407_s7, 4  ;;  %p355_p8 = scmp.ne.s32.totalorder %s493_s1, %s354_s11  ;;  %s31_s8 = int_to_ptr.vmem [resolvable:$true] %s30_s8 }
  0x15   :  { %p358_p9 = scmp.lt.u32.totalorder %s354_s11, %s493_s1 }
  0x17   :  { %p360_p10 = pnand %p358_p9, %p355_p8 }
  0x19   :  { %363 = shalt.err (!%p360_p10)
}
  0x1a   :  { %s364_s16 = scalar_lea.vmem %s31_s8, 1024  ;;  %p369_p12 = scmp.lt.s32.totalorder %s31_s8, %s31_s8 }
  0x1b   :  { %p365_p11 = scmp.ne.s32.totalorder %s31_s8, %s364_s16  ;;  %p370_p13 = scmp.lt.s32.totalorder %s364_s16, %s364_s16 }
  0x1d   :  { %p371_p0 = por %p370_p13, %p369_p12 }
  0x1f   :  { %p372_p1 = pnand %p371_p0, %p365_p11 }
  0x21   :  { %375 = shalt.err (!%p372_p1)
}
  0x22   :  { %s408_s0 = smov 64   ;;  %s409_s17 = smov 4  }
  0x23   :  { %36 = dma.hbm_to_vmem [thread:$0]  %s493_s1, 1024, %s31_s8, [#allocation6], %s408_s0, %s408_s0, %s409_s17  }
  0x24   :  { %398 = dma.done.wait [#allocation3], 512  }
  0x25   :  { %399 = vsyncadd [#allocation3], 4294966784 }
  0x26   :  { %400 = dma.done.wait [#allocation6], 1024  }
  0x27   :  { %401 = vsyncadd [#allocation6], 4294966272  ;;  %v316_v0 = vld [vmem:[#allocation5] sm:$0xff]   ;;  %v317_v1 = vld [vmem:[#allocation5 + $0x8] sm:$0xff]  }
  0x28   :  { %289 = vmatprep.subr.bf16.mxu0 %v316_v0  ;;  %v318_v2 = vld [vmem:[#allocation5 + $0x10] sm:$0xff]   ;;  %v319_v3 = vld [vmem:[#allocation5 + $0x18] sm:$0xff]   ;;  %v50_v4 = vld [vmem:[#allocation2] sm:$0xff] }
  0x29   :  { %290 = vmatpush3.bf16.msra.mxu0 %v316_v0  ;;  %v51_v5 = vld [vmem:[#allocation2 + $0x8] sm:$0xff]  ;;  %v320_v7 = vld [vmem:[#allocation5 + $0x20] sm:$0xff]   ;;  %v322_v9 = vld [vmem:[#allocation5 + $0x30] sm:$0xff]  }
  0x2a   :  { %291 = vmatprep.subr.bf16.mxu0 %v317_v1  ;;  %v54_v6 = vpack.c.bf16 %v51_v5, %v50_v4  ;;  %v321_v8 = vld [vmem:[#allocation5 + $0x28] sm:$0xff]   ;;  %v323_v10 = vld [vmem:[#allocation5 + $0x38] sm:$0xff]   ;;  %v52_v11 = vld [vmem:[#allocation2 + $0x10] sm:$0xff] }
  0x2b   :  { %v53_v12 = vld [vmem:[#allocation2 + $0x18] sm:$0xff]  ;;  %v268_v14 = vld [vmem:[%s494_s2] ss:$0 sm:$0xff] }
  0x2c   :  { %305 = vmatprep.mubr.bf16.mxu0 %v54_v6  ;;  %v55_v13 = vpack.c.bf16 %v53_v12, %v52_v11  ;;  %v277_v55 = vld [vmem:[%s495_s3] ss:$0 sm:$0xff]  ;;  %s410_s3 = smov [#allocation7]  }
  0x2d   :  { %292 = vmatpush3.bf16.msra.mxu0 %v317_v1  ;;  %v278_v58 = vld [vmem:[%s496_s4] ss:$0 sm:$0xff]  ;;  %s255_s24 = sshll.u32 %s410_s3, 4  ;;  %s256_s24 = int_to_ptr.vmem [resolvable:$true] %s255_s24 }
  0x2e   :  { %293 = vmatprep.subr.bf16.mxu0 %v318_v2  ;;  %s376_s4 = scalar_lea.vmem %s256_s24, 512  ;;  %p381_p3 = scmp.lt.s32.totalorder %s256_s24, %s256_s24 }
  0x2f   :  { %p377_p2 = scmp.ne.s32.totalorder %s256_s24, %s376_s4  ;;  %p382_p4 = scmp.lt.s32.totalorder %s376_s4, %s376_s4 }
  0x31   :  { %294 = vmatpush3.bf16.msra.mxu0 %v318_v2  ;;  %p383_p5 = por %p382_p4, %p381_p3 }
  0x32   :  { %295 = vmatprep.subr.bf16.mxu0 %v319_v3 }
  0x33   :  { %p384_p6 = pnand %p383_p5, %p377_p2 }
  0x35   :  { %296 = vmatpush3.bf16.msra.mxu0 %v319_v3 }
  0x36   :  { %297 = vmatprep.subr.bf16.mxu0 %v320_v7 }
  0x39   :  { %298 = vmatpush3.bf16.msra.mxu0 %v320_v7 }
  0x3a   :  { %299 = vmatprep.subr.bf16.mxu0 %v321_v8 }
  0x3d   :  { %300 = vmatpush3.bf16.msra.mxu0 %v321_v8 }
  0x3e   :  { %301 = vmatprep.subr.bf16.mxu0 %v322_v9 }
  0x41   :  { %302 = vmatpush3.bf16.msra.mxu0 %v322_v9 }
  0x42   :  { %303 = vmatprep.subr.bf16.mxu0 %v323_v10 }
  0x45   :  { %304 = vmatpush3.bf16.msra.mxu0 %v323_v10 }
  0x48   :  { %306 = vmatmul.mubr.bf16.vlgmr.msra.gmra.mrb[0].mxu0 %v55_v13 }
 0x11b   :  { %v307_v15 = vpop.f32.mrb[0].mxu0 }
 0x11c   :  { %v170_v16 = vadd.f32 %v307_v15, %v268_v14  ;;  %v161_v17 = vpop.f32.mrb[1].mxu0 }
 0x11d   :  { %v162_v18 = vadd.f32 %v268_v14, %v161_v17  ;;  %v308_v19 = vpop.f32.mrb[2].mxu0 }
 0x11e   :  { %v178_v20 = vmax.f32 %v170_v16, 0.0  ;;  %v173_v21 = vadd.f32 %v308_v19, %v268_v14  ;;  %v164_v22 = vpop.f32.mrb[3].mxu0 }
 0x11f   :  { %v176_v23 = vmax.f32 %v162_v18, 0.0  ;;  %v165_v24 = vadd.f32 %v268_v14, %v164_v22 }
 0x120   :  { %184 = vadd.xlane.f32.xlu1 %v178_v20  ;;  %v179_v25 = vmax.f32 %v173_v21, 0.0 }
 0x121   :  { %180 = vadd.xlane.f32.xlu0 %v176_v23  ;;  %v177_v26 = vmax.f32 %v165_v24, 0.0 }
 0x124   :  { %186 = vadd.xlane.f32.xlu1 %v179_v25 }
 0x125   :  { %182 = vadd.xlane.f32.xlu0 %v177_v26 }
 0x1ad   :  { %v185_v27 = vpop.xlane.xlu1 %184 }
 0x1ae   :  { %v181_v28 = vpop.xlane.xlu0 %180  ;;  %v190_v29 = vmul.f32 0.0078125, %v185_v27 }
 0x1af   :  { %v188_v30 = vmul.f32 0.0078125, %v181_v28 }
 0x1b0   :  { %v194_v34 = vsub.f32 %v178_v20, %v190_v29 }
 0x1b1   :  { %v192_v31 = vsub.f32 %v176_v23, %v188_v30  ;;  %v187_v32 = vpop.xlane.xlu1 %186 }
 0x1b2   :  { %v183_v33 = vpop.xlane.xlu0 %182  ;;  %v191_v35 = vmul.f32 0.0078125, %v187_v32  ;;  %v198_v40 = vmul.f32 %v194_v34, %v194_v34 }
 0x1b3   :  { %v189_v36 = vmul.f32 0.0078125, %v183_v33  ;;  %v196_v37 = vmul.f32 %v192_v31, %v192_v31 }
 0x1b4   :  { %v195_v39 = vsub.f32 %v179_v25, %v191_v35 }
 0x1b5   :  { %v193_v38 = vsub.f32 %v177_v26, %v189_v36  ;;  %200 = vadd.xlane.f32.xlu0 %v196_v37 }
 0x1b6   :  { %v199_v42 = vmul.f32 %v195_v39, %v195_v39 }
 0x1b7   :  { %v197_v41 = vmul.f32 %v193_v38, %v193_v38 }
 0x1b9   :  { %204 = vadd.xlane.f32.xlu0 %v198_v40  ;;  %202 = vadd.xlane.f32.xlu1 %v197_v41 }
 0x1bd   :  { %206 = vadd.xlane.f32.xlu1 %v199_v42 }
 0x242   :  { %v201_v43 = vpop.xlane.xlu0 %200 }
 0x243   :  { %v208_v44 = vmul.f32 0.0078125, %v201_v43 }
 0x245   :  { %v213_v45 = vadd.f32 1e-05, %v208_v44 }
 0x246   :  { %v203_v46 = vpop.xlane.xlu1 %202  ;;  %v205_v47 = vpop.xlane.xlu0 %204 }
 0x247   :  { %324 = vrsqrt.f32 %v213_v45  ;;  %v209_v48 = vmul.f32 0.0078125, %v203_v46  ;;  %v210_v49 = vmul.f32 0.0078125, %v205_v47 }
 0x249   :  { %v214_v50 = vadd.f32 1e-05, %v209_v48  ;;  %v215_v51 = vadd.f32 1e-05, %v210_v49 }
 0x24a   :  { %v207_v52 = vpop.xlane.xlu1 %206 }
 0x24b   :  { %326 = vrsqrt.f32 %v214_v50  ;;  %v211_v53 = vmul.f32 0.0078125, %v207_v52 }
 0x24c   :  { %328 = vrsqrt.f32 %v215_v51 }
 0x24d   :  { %v216_v54 = vadd.f32 1e-05, %v211_v53 }
 0x24f   :  { %330 = vrsqrt.f32 %v216_v54 }
 0x251   :  { %v325_v56 = vpop.eup %324 }
 0x252   :  { %v227_v57 = vmul.f32 %v325_v56, %v277_v55 }
 0x254   :  { %v231_v59 = vmul.f32 %v227_v57, %v192_v31 }
 0x255   :  { %v327_v60 = vpop.eup %326 }
 0x256   :  { %v329_v61 = vpop.eup %328  ;;  %v228_v62 = vmul.f32 %v327_v60, %v277_v55  ;;  %v242_v63 = vadd.f32 %v278_v58, %v231_v59 }
 0x257   :  { %v229_v0 = vmul.f32 %v329_v61, %v277_v55 }
 0x258   :  { %v232_v1 = vmul.f32 %v228_v62, %v193_v38  ;;  %246 = vst [vmem:[#allocation7] sm:$0xff] %v242_v63 }
 0x259   :  { %v331_v2 = vpop.eup %330  ;;  %v233_v3 = vmul.f32 %v229_v0, %v194_v34 }
 0x25a   :  { %v230_v4 = vmul.f32 %v331_v2, %v277_v55  ;;  %v243_v5 = vadd.f32 %v278_v58, %v232_v1 }
 0x25b   :  { %v244_v6 = vadd.f32 %v278_v58, %v233_v3 }
 0x25c   :  { %v234_v7 = vmul.f32 %v230_v4, %v195_v39  ;;  %247 = vst [vmem:[#allocation7 + $0x8] sm:$0xff] %v243_v5 }
 0x25d   :  { %248 = vst [vmem:[#allocation7 + $0x10] sm:$0xff] %v244_v6 }
 0x25e   :  { %v245_v8 = vadd.f32 %v278_v58, %v234_v7 }
 0x260   :  { %249 = vst [vmem:[#allocation7 + $0x18] sm:$0xff] %v245_v8 }
 0x261   :  { %387 = shalt.err (!%p384_p6)
}
 0x262   :  { %s388_s27 = scalar_lea.hbm %s497_s5, 512 }
 0x263   :  { %p389_p7 = scmp.ne.s32.totalorder %s497_s5, %s388_s27  ;;  %p392_p8 = scmp.lt.u32.totalorder %s388_s27, %s497_s5 }
 0x265   :  { %p394_p9 = pnand %p392_p8, %p389_p7 }
 0x267   :  { %397 = shalt.err (!%p394_p9)
}
 0x268   :  { %261 = dma.vmem_to_hbm [thread:$0]  %s256_s24, 512, %s497_s5, [#allocation4], %s405_s28, %s405_s28, %s406_s29  }
 0x269   :  { %402 = dma.done.wait [#allocation4], 512  }
 0x26a   :  { %403 = vsyncadd [#allocation4], 4294966784 }
 0x26b   :  { %265 = vsyncpa [#allocation3], 1 }
 0x26c   :  { %266 = vsyncpa [#allocation6], 1 }
 0x26d   :  { %267 = vsyncpa [#allocation4], 1 }

</bundles_post_ra>
